<compile_context>
chip_gen: v7x
topology: tpu7x:2x2x1
jax: 0.10.0
libtpu: 0.0.40
codegen_flags: <defaults>
</compile_context>

<pallas_src>
import jax
import jax.numpy as jnp
from jax.experimental import pallas as pl
from jax.experimental.pallas import tpu as pltpu


HIDDEN = 30  # logical hidden width of the PyTorch module


def _round_up(x, m):
    return (x + m - 1) // m * m


def fc2_kernel(xt_ref, w1t_ref, b1t_ref, w2t_ref, b2t_ref, ot_ref):
    """One lane-dense batch tile of sigmoid(relu(x @ W1 + b1) @ W2 + b2), transposed.

    xt_ref : (d_in,  tm)    streamed input tile (batch on lanes)
    w1t_ref: (h_pad, d_in)  resident fc1 weight^T (hidden zero-padded to h_pad)
    b1t_ref: (h_pad, 1)     resident fc1 bias
    w2t_ref: (d_out, h_pad) resident fc2 weight^T
    b2t_ref: (d_out, 1)     resident fc2 bias
    ot_ref : (d_out, tm)    lane-dense output tile
    """
    xt = xt_ref[...].astype(jnp.float32)
    # fc1 + ReLU: MXU matmul, bias/ReLU on the VPU (broadcast along lanes).
    ht = jnp.dot(w1t_ref[...], xt, preferred_element_type=jnp.float32)
    ht = jnp.maximum(ht + b1t_ref[...], 0.0)
    # fc2 + sigmoid: MXU matmul; sigmoid's exp goes to the EUP slot.
    zt = jnp.dot(w2t_ref[...], ht, preferred_element_type=jnp.float32)
    zt = zt + b2t_ref[...]
    ot_ref[...] = jax.nn.sigmoid(zt).astype(ot_ref.dtype)


def fc2_forward(x, w1, b1, w2, b2, *, block_m=16384):
    """sigmoid(relu(x @ w1 + b1) @ w2 + b2), fused on TPU.

    x : (B, d_in) — streamed in its own dtype (f32 or bf16); compute is f32.
    w1: (d_in, H), b1: (H,)|(1,H), w2: (H, d_out), b2: (d_out,)|(1,d_out).
    block_m: max batch-tile width in lanes (multiple of 128).
    """
    assert block_m % 128 == 0, "block_m must be a multiple of 128 lanes"
    B, d_in = x.shape
    hidden = w1.shape[1]
    d_out = w2.shape[1]

    # Transposed, zero-padded parameters (hidden -> multiple of 8 sublanes).
    # Exact: ReLU(0 + 0) = 0 and the padded W2^T columns are zero.
    h_pad = _round_up(hidden, 8)
    w1f = w1.astype(jnp.float32)
    w2f = w2.astype(jnp.float32)
    b1f = b1.astype(jnp.float32).reshape(-1)
    b2f = b2.astype(jnp.float32).reshape(-1)
    w1t = jnp.pad(w1f.T, ((0, h_pad - hidden), (0, 0)))                # (h_pad, d_in)
    b1t = jnp.pad(b1f.reshape(-1, 1), ((0, h_pad - hidden), (0, 0)))   # (h_pad, 1)
    w2t = jnp.pad(w2f.T, ((0, 0), (0, h_pad - hidden)))                # (d_out, h_pad)
    b2t = b2f.reshape(-1, 1)                                           # (d_out, 1)

    # Batch tiling on the LANE axis of the transposed problem. Tile size is
    # chosen so ragged padding stays < 128 lanes per tile; when there is more
    # than one tile, round the count up to even so the "parallel" axis can
    # feed both v7x TensorCores (harmless single-TC on v5e/v6e).
    if B <= block_m:
        tm, n = B, 1
    else:
        n = pl.cdiv(B, block_m)
        if n % 2:
            n += 1
        tm = _round_up(pl.cdiv(B, n), 128)
        n = pl.cdiv(B, tm)
    b_pad = n * tm

    # Feature-major (lane-dense) input. The ragged-batch pad fuses into the
    # same XLA transpose pass, so there is no separate pad round trip in HBM.
    xt = jnp.pad(x, ((0, b_pad - B), (0, 0))).T if b_pad != B else x.T

    cost = pl.CostEstimate(
        flops=2 * b_pad * (d_in * h_pad + h_pad * d_out),
        transcendentals=b_pad * d_out,  # sigmoid exp
        bytes_accessed=(xt.size * xt.dtype.itemsize
                        + b_pad * d_out * x.dtype.itemsize
                        + 4 * (w1t.size + b1t.size + w2t.size + b2t.size)),
    )

    out_t = pl.pallas_call(
        fc2_kernel,
        out_shape=jax.ShapeDtypeStruct((d_out, b_pad), x.dtype),
        grid=(n,),
        in_specs=[
            pl.BlockSpec((d_in, tm), lambda i: (0, i)),      # streamed x^T tiles
            pl.BlockSpec((h_pad, d_in), lambda i: (0, 0)),   # resident W1^T
            pl.BlockSpec((h_pad, 1), lambda i: (0, 0)),      # resident b1
            pl.BlockSpec((d_out, h_pad), lambda i: (0, 0)),  # resident W2^T
            pl.BlockSpec((d_out, 1), lambda i: (0, 0)),      # resident b2
        ],
        out_specs=pl.BlockSpec((d_out, tm), lambda i: (0, i)),  # lane-dense out^T
        compiler_params=pltpu.CompilerParams(
            # Batch tiles shard across both TensorCores on v7x; no-op on v5e/v6e.
            dimension_semantics=("parallel",),
            # Large tiles are ~10 MiB in the transposed layout; 48 MiB leaves
            # headroom on every generation (v7x physical VMEM is 64 MiB).
            vmem_limit_bytes=48 * 1024 * 1024,
        ),
        cost_estimate=cost,
    )(xt, w1t, b1t, w2t, b2t)

    return out_t[:, :B].T


def init_params(key, input_dim, output_dim, hidden=HIDDEN):
    """Deterministic init mimicking torch.nn.Linear (uniform +-1/sqrt(fan_in))."""
    k1, k2, k3, k4 = jax.random.split(key, 4)
    bound1 = 1.0 / jnp.sqrt(input_dim)
    bound2 = 1.0 / jnp.sqrt(hidden)
    w1 = jax.random.uniform(k1, (input_dim, hidden), jnp.float32, -bound1, bound1)
    b1 = jax.random.uniform(k2, (1, hidden), jnp.float32, -bound1, bound1)
    w2 = jax.random.uniform(k3, (hidden, output_dim), jnp.float32, -bound2, bound2)
    b2 = jax.random.uniform(k4, (1, output_dim), jnp.float32, -bound2, bound2)
    return w1, b1, w2, b2


if __name__ == "__main__":
    key = jax.random.PRNGKey(0)
    batch, input_dim, output_dim = 8, 32, 16

    k_x, k_p = jax.random.split(key)
    x = jax.random.normal(k_x, (batch, input_dim), jnp.float32)
    w1, b1, w2, b2 = init_params(k_p, input_dim, output_dim)

    def ref_fn(xx):
        # Same semantics as the PyTorch forward.
        return jax.nn.sigmoid(jnp.maximum(xx @ w1 + b1, 0.0) @ w2 + b2)

    # Small-batch path (single tile, full-extent lane block).
    out = jax.block_until_ready(fc2_forward(x, w1, b1, w2, b2))
    assert out.shape == (batch, output_dim)
    assert jnp.allclose(out, ref_fn(x), atol=1e-5, rtol=1e-5)

    # Multi-tile + ragged-batch path (B=1000 -> 4 tiles of 256 lanes, 24 pad cols).
    x_big = jax.random.normal(jax.random.PRNGKey(1), (1000, input_dim), jnp.float32)
    out_big = jax.block_until_ready(fc2_forward(x_big, w1, b1, w2, b2, block_m=256))
    assert out_big.shape == (1000, output_dim)
    assert jnp.allclose(out_big, ref_fn(x_big), atol=1e-5, rtol=1e-5)

    # bf16-streamed input path (halves x HBM traffic; compute stays f32).
    x_bf16 = x_big.astype(jnp.bfloat16)
    out_bf16 = jax.block_until_ready(fc2_forward(x_bf16, w1, b1, w2, b2, block_m=256))
    assert out_bf16.shape == (1000, output_dim)
    assert jnp.allclose(out_bf16.astype(jnp.float32),
                        ref_fn(x_bf16.astype(jnp.float32)), atol=2e-2)

    print("KERNEL_OK")
</pallas_src>

<mosaic_0001>
module attributes {stable_mosaic.version = 11 : i64} {
  func.func @fc2_kernel(%arg0: i32, %arg1: memref<32x8xf32, #tpu.memory_space<vmem>>, %arg2: memref<32x32xf32, #tpu.memory_space<vmem>>, %arg3: memref<32x1xf32, #tpu.memory_space<vmem>>, %arg4: memref<16x32xf32, #tpu.memory_space<vmem>>, %arg5: memref<16x1xf32, #tpu.memory_space<vmem>>, %arg6: memref<16x8xf32, #tpu.memory_space<vmem>>) attributes {dimension_semantics = [#tpu.dimension_semantics<parallel>], iteration_bounds = array<i64: 1>, scalar_prefetch = 0 : i64, scratch_operands = 0 : i64, tpu.core_type = #tpu.core_type<tc>, window_params = [{transform_indices = @transform_0, window_bounds = array<i64: 32, 8>}, {pipeline_mode = #tpu.pipeline_mode<synchronous>, transform_indices = @transform_1, window_bounds = array<i64: 32, 32>}, {pipeline_mode = #tpu.pipeline_mode<synchronous>, transform_indices = @transform_2, window_bounds = array<i64: 32, 1>}, {pipeline_mode = #tpu.pipeline_mode<synchronous>, transform_indices = @transform_3, window_bounds = array<i64: 16, 32>}, {pipeline_mode = #tpu.pipeline_mode<synchronous>, transform_indices = @transform_4, window_bounds = array<i64: 16, 1>}, {transform_indices = @transform_5, window_bounds = array<i64: 16, 8>}]} {
    %c0 = arith.constant 0 : index
    %c0_0 = arith.constant 0 : index
    %0 = vector.load %arg1[%c0, %c0_0] : memref<32x8xf32, #tpu.memory_space<vmem>>, vector<32x8xf32>
    %c0_1 = arith.constant 0 : index
    %c0_2 = arith.constant 0 : index
    %1 = vector.load %arg2[%c0_1, %c0_2] : memref<32x32xf32, #tpu.memory_space<vmem>>, vector<32x32xf32>
    %cst = arith.constant dense<0.000000e+00> : vector<32x8xf32>
    %2 = tpu.matmul %1, %0, %cst {dimension_numbers = #tpu.dot_dimension_numbers<[1], [0], [0], [1], [0, 0, 1, 1], [], []>} : vector<32x32xf32>, vector<32x8xf32>, vector<32x8xf32> -> vector<32x8xf32>
    %c0_3 = arith.constant 0 : index
    %c0_4 = arith.constant 0 : index
    %3 = vector.load %arg3[%c0_3, %c0_4] : memref<32x1xf32, #tpu.memory_space<vmem>>, vector<32x1xf32>
    %4 = vector.broadcast %3 : vector<32x1xf32> to vector<32x8xf32>
    %5 = arith.addf %2, %4 : vector<32x8xf32>
    %cst_5 = arith.constant 0.000000e+00 : f32
    %6 = vector.broadcast %cst_5 : f32 to vector<32x8xf32>
    %7 = arith.maximumf %5, %6 : vector<32x8xf32>
    %c0_6 = arith.constant 0 : index
    %c0_7 = arith.constant 0 : index
    %8 = vector.load %arg4[%c0_6, %c0_7] : memref<16x32xf32, #tpu.memory_space<vmem>>, vector<16x32xf32>
    %cst_8 = arith.constant dense<0.000000e+00> : vector<16x8xf32>
    %9 = tpu.matmul %8, %7, %cst_8 {dimension_numbers = #tpu.dot_dimension_numbers<[1], [0], [0], [1], [0, 0, 1, 1], [], []>} : vector<16x32xf32>, vector<32x8xf32>, vector<16x8xf32> -> vector<16x8xf32>
    %c0_9 = arith.constant 0 : index
    %c0_10 = arith.constant 0 : index
    %10 = vector.load %arg5[%c0_9, %c0_10] : memref<16x1xf32, #tpu.memory_space<vmem>>, vector<16x1xf32>
    %11 = vector.broadcast %10 : vector<16x1xf32> to vector<16x8xf32>
    %12 = arith.addf %9, %11 : vector<16x8xf32>
    %13 = arith.negf %12 : vector<16x8xf32>
    %14 = math.exp %13 : vector<16x8xf32>
    %cst_11 = arith.constant 1.000000e+00 : f32
    %15 = vector.broadcast %cst_11 : f32 to vector<16x8xf32>
    %16 = arith.addf %15, %14 : vector<16x8xf32>
    %17 = arith.divf %15, %16 : vector<16x8xf32>
    %c0_12 = arith.constant 0 : index
    %c0_13 = arith.constant 0 : index
    %18 = vector.load %arg6[%c0_12, %c0_13] : memref<16x8xf32, #tpu.memory_space<vmem>>, vector<16x8xf32>
    tpu.vector_store %arg6[%c0_12, %c0_13], %17 {strides = array<i32>} : memref<16x8xf32, #tpu.memory_space<vmem>>, vector<16x8xf32>,
    return
  }
  func.func @transform_0(%arg0: i32) -> (i32, i32) {
    %c0_i32 = arith.constant 0 : i32
    %c0_i32_0 = arith.constant 0 : i32
    return %c0_i32, %arg0 : i32, i32
  }
  func.func @transform_1(%arg0: i32) -> (i32, i32) {
    %c0_i32 = arith.constant 0 : i32
    %c0_i32_0 = arith.constant 0 : i32
    %c0_i32_1 = arith.constant 0 : i32
    return %c0_i32, %c0_i32_0 : i32, i32
  }
  func.func @transform_2(%arg0: i32) -> (i32, i32) {
    %c0_i32 = arith.constant 0 : i32
    %c0_i32_0 = arith.constant 0 : i32
    %c0_i32_1 = arith.constant 0 : i32
    return %c0_i32, %c0_i32_0 : i32, i32
  }
  func.func @transform_3(%arg0: i32) -> (i32, i32) {
    %c0_i32 = arith.constant 0 : i32
    %c0_i32_0 = arith.constant 0 : i32
    %c0_i32_1 = arith.constant 0 : i32
    return %c0_i32, %c0_i32_0 : i32, i32
  }
  func.func @transform_4(%arg0: i32) -> (i32, i32) {
    %c0_i32 = arith.constant 0 : i32
    %c0_i32_0 = arith.constant 0 : i32
    %c0_i32_1 = arith.constant 0 : i32
    return %c0_i32, %c0_i32_0 : i32, i32
  }
  func.func @transform_5(%arg0: i32) -> (i32, i32) {
    %c0_i32 = arith.constant 0 : i32
    %c0_i32_0 = arith.constant 0 : i32
    return %c0_i32, %arg0 : i32, i32
  }
}

</mosaic_0001>

<bundles_post_ra>
// kernel: tpu_custom_call.1
= control target key start
LH: loop header
LB: loop body
LE: loop exit
PB: predicated region body
PF: predicated region fallthrough
CT: control target
= control target key end

     0   :  { %vm52_vm0 = vcmask 261120   ;;  %v342_v3 = vmov 0   ;;  %vm261_vm1 = vcmask 64512   ;;  %s433_s0 = inlined_call_operand.vmem [shape: f32[32,8], index: 0, kind: input, shape index: {}]   ;;  %s434_s1 = inlined_call_operand.vmem [shape: f32[32,32], index: 1, kind: input, shape index: {}]   ;;  %s435_s2 = inlined_call_operand.vmem [shape: f32[32,1], index: 2, kind: input, shape index: {}]   ;;  %s436_s4 = inlined_call_operand.vmem [shape: f32[16,1], index: 4, kind: input, shape index: {}]   ;;  %s437_s3 = inlined_call_operand.vmem [shape: f32[16,32], index: 3, kind: input, shape index: {}]   ;;  %s438_s5 = inlined_call_operand.vmem [shape: f32[16,8], index: 5, kind: output, shape index: {}]  }
   0x1   :  { %v20_v0 = vld [vmem:[%s433_s0] sm:$0xff]  ;;  %v21_v1 = vld [vmem:[%s433_s0 + $0x8] sm:$0xff]  ;;  %v22_v2 = vld [vmem:[%s433_s0 + $0x10] sm:$0xff]  ;;  %332 = vset.pattern.permute.xlu0 %v342_v3  ;;  %333 = vset.pattern.permute.xlu1 %v342_v3 }
   0x2   :  { %v315_v4 = vpack.c.bf16 %v21_v1, %v20_v0  ;;  %v23_v5 = vld [vmem:[%s433_s0 + $0x18] sm:$0xff]  ;;  %v24_v6 = vld [vmem:[%s434_s1] sm:$0xff]  ;;  %v30_v9 = vld [vmem:[%s435_s2 + $0x10] sm:$0xff] }
   0x3   :  { %v319_v7 = vpack.c.bf16 %v23_v5, %v22_v2  ;;  %298 = vmatprep.mubr.msk.f32.mxu0 %vm52_vm0, %v24_v6  ;;  %v28_v8 = vld [vmem:[%s435_s2] sm:$0xff]  ;;  %44 = vperm.xlu1 %333, %v30_v9   ;;  %v29_v10 = vld [vmem:[%s435_s2 + $0x8] sm:$0xff]  ;;  %v31_v11 = vld [vmem:[%s435_s2 + $0x18] sm:$0xff] }
   0x4   :  { %316 = vmatprep.subr.bf16.mxu0 %v315_v4  ;;  %34 = vperm.xlu0 %332, %v28_v8   ;;  %v25_v12 = vld [vmem:[%s434_s1 + $0x8] sm:$0xff]  ;;  %v156_v13 = vld [vmem:[%s436_s4] sm:$0xff]  ;;  %v26_v14 = vld [vmem:[%s434_s1 + $0x10] sm:$0xff] }
   0x5   :  { %318 = vmatpush3.bf16.msra.mxu0 %v315_v4  ;;  %v157_v15 = vld [vmem:[%s436_s4 + $0x8] sm:$0xff]  ;;  %v27_v16 = vld [vmem:[%s434_s1 + $0x18] sm:$0xff]  ;;  %v154_v17 = vld [vmem:[%s437_s3] sm:$0xff] }
   0x6   :  { %320 = vmatprep.subr.bf16.mxu0 %v319_v7  ;;  %312 = vmatprep.mubr.msk.f32.mxu1 %vm52_vm0, %v154_v17  ;;  %v155_v36 = vld [vmem:[%s437_s3 + $0x8] sm:$0xff] }
   0x7   :  { %49 = vperm.xlu1 %333, %v31_v11  }
   0x8   :  { %39 = vperm.xlu0 %332, %v29_v10  }
   0x9   :  { %322 = vmatpush3.bf16.msra.mxu0 %v319_v7 }
   0xb   :  { %165 = vperm.xlu1 %333, %v157_v15  }
   0xc   :  { %299 = vmatmul.mubr.msk.f32.vlgmr.msra.gmra.mrb[0].mxu0 %vm52_vm0, %v25_v12  ;;  %160 = vperm.xlu0 %332, %v156_v13  }
   0xd   :  { %301 = vmatprep.mubr.msk.f32.mxu0 %vm52_vm0, %v26_v14 }
  0x10   :  { %302 = vmatmul.mubr.msk.f32.gmra.mrb[2].mxu0 %vm52_vm0, %v27_v16 }
  0x82   :  { %v45_v19 = vpop.permute.xlu1 %44 }
  0x83   :  { %v35_v18 = vpop.permute.xlu0 %34 }
  0x86   :  { %v50_v26 = vpop.permute.xlu1 %49 }
  0x87   :  { %v40_v20 = vpop.permute.xlu0 %39 }
  0x8a   :  { %v166_v37 = vpop.permute.xlu1 %165 }
  0x8b   :  { %v161_v39 = vpop.permute.xlu0 %160 }
  0xdf   :  { %v300_v21 = vpop.f32.mrb[0].mxu0 }
  0xe0   :  { %v137_v22 = vadd.f32 %v300_v21, %v40_v20  ;;  %v131_v23 = vpop.f32.mrb[1].mxu0 }
  0xe1   :  { %v132_v24 = vadd.f32 %v131_v23, %v35_v18 }
  0xe2   :  { %v151_v25 = vmax.f32 %v137_v22, 0.0 }
  0xe3   :  { %v150_v27 = vmax.f32 %v132_v24, 0.0  ;;  %v303_v28 = vpop.f32.mrb[2].mxu0 }
  0xe4   :  { %v147_v29 = vadd.f32 %v303_v28, %v50_v26  ;;  %v141_v30 = vpop.f32.mrb[3].mxu0 }
  0xe5   :  { %v142_v31 = vadd.f32 %v141_v30, %v45_v19  ;;  %v323_v32 = vpack.c.bf16 %v151_v25, %v150_v27 }
  0xe6   :  { %v153_v33 = vmax.f32 %v147_v29, 0.0 }
  0xe7   :  { %v152_v34 = vmax.f32 %v142_v31, 0.0  ;;  %324 = vmatprep.subr.bf16.mxu1 %v323_v32 }
  0xe8   :  { %326 = vmatpush3.bf16.msra.mxu1 %v323_v32 }
  0xe9   :  { %v327_v35 = vpack.c.bf16 %v153_v33, %v152_v34 }
  0xeb   :  { %328 = vmatprep.subr.bf16.mxu1 %v327_v35 }
  0xec   :  { %330 = vmatpush3.bf16.msra.mxu1 %v327_v35 }
  0xef   :  { %313 = vmatmul.mubr.msk.f32.vlgmr.msra.gmra.mrb[0].mxu1 %vm52_vm0, %v155_v36 }
 0x1c2   :  { %v314_v38 = vpop.f32.mrb[0].mxu1 }
 0x1c3   :  { %v246_v40 = vadd.f32 %v314_v38, %v166_v37  ;;  %v240_v41 = vpop.f32.mrb[1].mxu1 }
 0x1c4   :  { %v241_v42 = vadd.f32 %v240_v41, %v161_v39 }
 0x1c5   :  { %v275_v43 = vmul.f32 -1.442695, %v246_v40 }
 0x1c6   :  { %v274_v44 = vmul.f32 -1.442695, %v241_v42 }
 0x1c7   :  { %334 = vpow2.f32 %v275_v43 }
 0x1c8   :  { %336 = vpow2.f32 %v274_v44 }
 0x1d1   :  { %v335_v45 = vpop.eup %334 }
 0x1d2   :  { %v337_v46 = vpop.eup %336  ;;  %v256_v47 = vadd.f32 1.0, %v335_v45 }
 0x1d3   :  { %v255_v48 = vadd.f32 1.0, %v337_v46 }
 0x1d4   :  { %338 = vrcp.f32 %v256_v47 }
 0x1d5   :  { %340 = vrcp.f32 %v255_v48 }
 0x1de   :  { %v339_v49 = vpop.eup %338 }
 0x1df   :  { %v341_v50 = vpop.eup %340  ;;  %263 = vst.msk [vmem:[%s438_s5 + $0x8] sm:$0xff] %vm261_vm1, %v339_v49 }
 0x1e0   :  { %262 = vst.msk [vmem:[%s438_s5] sm:$0xff] %vm261_vm1, %v341_v50 }

</bundles_post_ra>
